<compile_context>
chip_gen: v7x
topology: tpu7x:2x2x1
jax: 0.10.0
libtpu: 0.0.40
codegen_flags: <defaults>
</compile_context>

<pallas_src>
import jax
import jax.numpy as jnp
from jax import lax
from jax.experimental import pallas as pl
from jax.experimental.pallas import tpu as pltpu


def attention_block_kernel(x_ref, w1_ref, b1_ref, w2t_ref, b2_ref, o_ref):
    # x_ref:   (TB, F)   input tile (compute dtype: f32 or bf16)
    # w1_ref:  (H, F)    first linear weight, natural PyTorch layout (lane-dense)
    # b1_ref:  (1, H)    first linear bias (f32)
    # w2t_ref: (H, F)    second linear weight, pre-transposed on host (lane-dense)
    # b2_ref:  (1, F)    second linear bias (f32)
    # o_ref:   (TB, F)   gated output
    x = x_ref[...]

    # x @ W1^T: contract the F axis of x with the F axis of W1 (trans_b style),
    # so W1 stays in its lane-dense (32, 128) layout. Accumulate in f32 on the MXU.
    h = lax.dot_general(
        x, w1_ref[...],
        dimension_numbers=(((1,), (1,)), ((), ())),
        preferred_element_type=jnp.float32,
    )
    h = jnp.maximum(h + b1_ref[...], 0.0)                 # bias + ReLU in f32 (VPU)

    # h @ W2^T (W2 pre-transposed to (H, F)); feed the MXU in the compute dtype,
    # accumulate in f32.
    logits = jnp.dot(
        h.astype(w2t_ref.dtype), w2t_ref[...],
        preferred_element_type=jnp.float32,
    ) + b2_ref[...]
    attn = jax.nn.sigmoid(logits)                         # f32 sigmoid (EUP)

    # Gate in f32, store in the output dtype.
    o_ref[...] = (x.astype(jnp.float32) * attn).astype(o_ref.dtype)


def _round_up(a, m):
    return (a + m - 1) // m * m


def attention_block(x, w1, b1, w2, b2, *, tile_b=512, compute_dtype=None):
    """x: (B, F). Weights in PyTorch nn.Linear layout: w1 (32, F), b1 (32,),
    w2 (F, 32), b2 (F,). compute_dtype=jnp.bfloat16 halves HBM traffic on
    v6e/v7x (matmuls still accumulate in f32; ReLU/sigmoid/gating stay f32)."""
    B, F = x.shape
    H = w1.shape[0]
    dt = compute_dtype if compute_dtype is not None else x.dtype

    # Batch tile: as large as practical (amortizes per-step pipeline overhead),
    # multiple of 8 sublanes, never larger than the (padded) batch.
    # At tile_b=512 an f32 x/out tile is 512*128*4 = 256 KiB per buffer, so even
    # with double-buffering this stays far under v7x's 32 MiB scoped VMEM default.
    tb = min(int(tile_b), _round_up(B, 8))
    tb = max(8, _round_up(tb, 8))

    # Pad B up to a multiple of the tile so awkward batch sizes keep the big tile.
    Bp = _round_up(B, tb)
    xp = x.astype(dt)
    if Bp != B:
        xp = jnp.pad(xp, ((0, Bp - B), (0, 0)))

    w1c = w1.astype(dt)                     # (H, F)  natural, lane-dense
    w2t = w2.T.astype(dt)                   # (H, F)  one tiny host-side transpose
    b1r = b1.reshape(1, H).astype(jnp.float32)
    b2r = b2.reshape(1, F).astype(jnp.float32)

    grid = (Bp // tb,)                      # for large B this is >= 2, so the
                                            # "parallel" axis shards across v7x's 2 TCs
    out = pl.pallas_call(
        attention_block_kernel,
        out_shape=jax.ShapeDtypeStruct((Bp, F), dt),
        grid_spec=pltpu.PrefetchScalarGridSpec(
            num_scalar_prefetch=0,
            grid=grid,
            in_specs=[
                pl.BlockSpec((tb, F), lambda i: (i, 0)),   # x tile (streamed)
                pl.BlockSpec((H, F), lambda i: (0, 0)),    # W1 (resident)
                pl.BlockSpec((1, H), lambda i: (0, 0)),    # b1 (resident)
                pl.BlockSpec((H, F), lambda i: (0, 0)),    # W2^T (resident)
                pl.BlockSpec((1, F), lambda i: (0, 0)),    # b2 (resident)
            ],
            out_specs=pl.BlockSpec((tb, F), lambda i: (i, 0)),
        ),
        compiler_params=pltpu.CompilerParams(
            dimension_semantics=("parallel",)),
    )(xp, w1c, b1r, w2t, b2r)

    return out[:B] if Bp != B else out


def attention_block_ref(x, w1, b1, w2, b2):
    """Pure-JAX reference matching the PyTorch forward exactly (f32)."""
    h = jnp.maximum(x @ w1.T + b1, 0.0)
    attn = jax.nn.sigmoid(h @ w2.T + b2)
    return x * attn


if __name__ == "__main__":
    B = 300          # deliberately NOT a multiple of the tile -> exercises padding
    F = 128          # feature_size
    H = 32           # hidden size of the attention MLP (fixed by the module)

    key = jax.random.PRNGKey(0)
    kx, kw1, kb1, kw2, kb2 = jax.random.split(key, 5)

    x = jax.random.normal(kx, (B, F), dtype=jnp.float32)
    # Deterministic synthetic parameters (PyTorch nn.Linear shapes: (out, in))
    w1 = jax.random.normal(kw1, (H, F), dtype=jnp.float32) * 0.05
    b1 = jax.random.normal(kb1, (H,), dtype=jnp.float32) * 0.05
    w2 = jax.random.normal(kw2, (F, H), dtype=jnp.float32) * 0.05
    b2 = jax.random.normal(kb2, (F,), dtype=jnp.float32) * 0.05

    ref = attention_block_ref(x, w1, b1, w2, b2)

    # f32 path: exact match vs reference.
    out_f32 = jax.block_until_ready(attention_block(x, w1, b1, w2, b2, tile_b=512))
    assert out_f32.shape == (B, F)
    assert jnp.allclose(out_f32, ref, atol=1e-5, rtol=1e-5), "f32 mismatch vs reference"

    # bf16 storage/matmul path (v6e/v7x bandwidth win): loose tolerance vs f32 ref.
    out_bf16 = jax.block_until_ready(
        attention_block(x, w1, b1, w2, b2, tile_b=512, compute_dtype=jnp.bfloat16))
    assert out_bf16.shape == (B, F)
    assert jnp.allclose(out_bf16.astype(jnp.float32), ref, atol=5e-2, rtol=5e-2), \
        "bf16 mismatch vs reference"

    print("KERNEL_OK")
</pallas_src>

<mosaic_0001>
module attributes {stable_mosaic.version = 11 : i64} {
  func.func @attention_block_kernel(%arg0: i32, %arg1: memref<304x128xf32, #tpu.memory_space<vmem>>, %arg2: memref<32x128xf32, #tpu.memory_space<vmem>>, %arg3: memref<1x32xf32, #tpu.memory_space<vmem>>, %arg4: memref<32x128xf32, #tpu.memory_space<vmem>>, %arg5: memref<1x128xf32, #tpu.memory_space<vmem>>, %arg6: memref<304x128xf32, #tpu.memory_space<vmem>>) attributes {dimension_semantics = [#tpu.dimension_semantics<parallel>], iteration_bounds = array<i64: 1>, scalar_prefetch = 0 : i64, scratch_operands = 0 : i64, tpu.core_type = #tpu.core_type<tc>, window_params = [{transform_indices = @transform_0, window_bounds = array<i64: 304, 128>}, {pipeline_mode = #tpu.pipeline_mode<synchronous>, transform_indices = @transform_1, window_bounds = array<i64: 32, 128>}, {pipeline_mode = #tpu.pipeline_mode<synchronous>, transform_indices = @transform_2, window_bounds = array<i64: 1, 32>}, {pipeline_mode = #tpu.pipeline_mode<synchronous>, transform_indices = @transform_3, window_bounds = array<i64: 32, 128>}, {pipeline_mode = #tpu.pipeline_mode<synchronous>, transform_indices = @transform_4, window_bounds = array<i64: 1, 128>}, {transform_indices = @transform_5, window_bounds = array<i64: 304, 128>}]} {
    %c0 = arith.constant 0 : index
    %c0_0 = arith.constant 0 : index
    %0 = vector.load %arg1[%c0, %c0_0] : memref<304x128xf32, #tpu.memory_space<vmem>>, vector<304x128xf32>
    %c0_1 = arith.constant 0 : index
    %c0_2 = arith.constant 0 : index
    %1 = vector.load %arg2[%c0_1, %c0_2] : memref<32x128xf32, #tpu.memory_space<vmem>>, vector<32x128xf32>
    %cst = arith.constant dense<0.000000e+00> : vector<304x32xf32>
    %2 = tpu.matmul %0, %1, %cst {dimension_numbers = #tpu.dot_dimension_numbers<[1], [1], [0], [0], [0, 0, 1, 0], [], []>} : vector<304x128xf32>, vector<32x128xf32>, vector<304x32xf32> -> vector<304x32xf32>
    %c0_3 = arith.constant 0 : index
    %c0_4 = arith.constant 0 : index
    %3 = vector.load %arg3[%c0_3, %c0_4] : memref<1x32xf32, #tpu.memory_space<vmem>>, vector<1x32xf32>
    %4 = vector.broadcast %3 : vector<1x32xf32> to vector<304x32xf32>
    %5 = arith.addf %2, %4 : vector<304x32xf32>
    %cst_5 = arith.constant 0.000000e+00 : f32
    %6 = vector.broadcast %cst_5 : f32 to vector<304x32xf32>
    %7 = arith.maximumf %5, %6 : vector<304x32xf32>
    %c0_6 = arith.constant 0 : index
    %c0_7 = arith.constant 0 : index
    %8 = vector.load %arg4[%c0_6, %c0_7] : memref<32x128xf32, #tpu.memory_space<vmem>>, vector<32x128xf32>
    %cst_8 = arith.constant dense<0.000000e+00> : vector<304x128xf32>
    %9 = tpu.matmul %7, %8, %cst_8 {dimension_numbers = #tpu.dot_dimension_numbers<[1], [0], [0], [1], [0, 0, 1, 1], [], []>} : vector<304x32xf32>, vector<32x128xf32>, vector<304x128xf32> -> vector<304x128xf32>
    %c0_9 = arith.constant 0 : index
    %c0_10 = arith.constant 0 : index
    %10 = vector.load %arg5[%c0_9, %c0_10] : memref<1x128xf32, #tpu.memory_space<vmem>>, vector<1x128xf32>
    %11 = vector.broadcast %10 : vector<1x128xf32> to vector<304x128xf32>
    %12 = arith.addf %9, %11 : vector<304x128xf32>
    %13 = arith.negf %12 : vector<304x128xf32>
    %14 = math.exp %13 : vector<304x128xf32>
    %cst_11 = arith.constant 1.000000e+00 : f32
    %15 = vector.broadcast %cst_11 : f32 to vector<304x128xf32>
    %16 = arith.addf %15, %14 : vector<304x128xf32>
    %17 = arith.divf %15, %16 : vector<304x128xf32>
    %18 = arith.mulf %0, %17 : vector<304x128xf32>
    %c0_12 = arith.constant 0 : index
    %c0_13 = arith.constant 0 : index
    %19 = vector.load %arg6[%c0_12, %c0_13] : memref<304x128xf32, #tpu.memory_space<vmem>>, vector<304x128xf32>
    tpu.vector_store %arg6[%c0_12, %c0_13], %18 {strides = array<i32>} : memref<304x128xf32, #tpu.memory_space<vmem>>, vector<304x128xf32>,
    return
  }
  func.func @transform_0(%arg0: i32) -> (i32, i32) {
    %c0_i32 = arith.constant 0 : i32
    %c0_i32_0 = arith.constant 0 : i32
    return %arg0, %c0_i32 : i32, i32
  }
  func.func @transform_1(%arg0: i32) -> (i32, i32) {
    %c0_i32 = arith.constant 0 : i32
    %c0_i32_0 = arith.constant 0 : i32
    %c0_i32_1 = arith.constant 0 : i32
    return %c0_i32, %c0_i32_0 : i32, i32
  }
  func.func @transform_2(%arg0: i32) -> (i32, i32) {
    %c0_i32 = arith.constant 0 : i32
    %c0_i32_0 = arith.constant 0 : i32
    %c0_i32_1 = arith.constant 0 : i32
    return %c0_i32, %c0_i32_0 : i32, i32
  }
  func.func @transform_3(%arg0: i32) -> (i32, i32) {
    %c0_i32 = arith.constant 0 : i32
    %c0_i32_0 = arith.constant 0 : i32
    %c0_i32_1 = arith.constant 0 : i32
    return %c0_i32, %c0_i32_0 : i32, i32
  }
  func.func @transform_4(%arg0: i32) -> (i32, i32) {
    %c0_i32 = arith.constant 0 : i32
    %c0_i32_0 = arith.constant 0 : i32
    %c0_i32_1 = arith.constant 0 : i32
    return %c0_i32, %c0_i32_0 : i32, i32
  }
  func.func @transform_5(%arg0: i32) -> (i32, i32) {
    %c0_i32 = arith.constant 0 : i32
    %c0_i32_0 = arith.constant 0 : i32
    return %arg0, %c0_i32 : i32, i32
  }
}

</mosaic_0001>

<bundles_post_ra>
// kernel: tpu_custom_call.1
= control target key start
LH: loop header
LB: loop body
LE: loop exit
PB: predicated region body
PF: predicated region fallthrough
CT: control target
= control target key end

     0   :  { %10 = vsyncpa [#allocation3], 0  ;;  %s2013_s0 = inlined_call_operand.hbm [shape: f32[304,128], index: 0, kind: input, shape index: {}]   ;;  %s2014_s1 = inlined_call_operand.hbm [shape: f32[32,128], index: 1, kind: input, shape index: {}]   ;;  %s2015_s2 = inlined_call_operand.vmem [shape: f32[1,32], index: 2, kind: input, shape index: {}]   ;;  %s2016_s3 = inlined_call_operand.hbm [shape: f32[32,128], index: 3, kind: input, shape index: {}]   ;;  %s2017_s4 = inlined_call_operand.vmem [shape: f32[1,128], index: 4, kind: input, shape index: {}]   ;;  %s2018_s5 = inlined_call_operand.hbm [shape: f32[304,128], index: 5, kind: output, shape index: {}]  }
   0x1   :  { %11 = vsyncpa [#allocation6], 0 }
   0x2   :  { %12 = vsyncpa [#allocation4], 0  ;;  %s1678_s18 = smov [#allocation5]   ;;  %s1679_s20 = smov [#allocation2]  }
   0x3   :  { %s30_s19 = sshll.u32 %s1678_s18, 4  ;;  %s18_s21 = sshll.u32 %s1679_s20, 4  ;;  %s31_s19 = int_to_ptr.vmem [resolvable:$true] %s30_s19  ;;  %s1714_s21 = int_to_ptr.vmem [resolvable:$true] %s18_s21 }
   0x4   :  { %s1584_s24 = scalar_lea.hbm %s2014_s1, 512 }
   0x5   :  { %p1585_p0 = scmp.ne.s32.totalorder %s2014_s1, %s1584_s24  ;;  %p1588_p1 = scmp.lt.u32.totalorder %s1584_s24, %s2014_s1 }
   0x7   :  { %p1590_p2 = pnand %p1588_p1, %p1585_p0 }
   0x9   :  { %1593 = shalt.err (!%p1590_p2)
}
   0xa   :  { %s1594_s29 = scalar_lea.vmem %s31_s19, 512  ;;  %p1599_p4 = scmp.lt.s32.totalorder %s31_s19, %s31_s19 }
   0xb   :  { %p1595_p3 = scmp.ne.s32.totalorder %s31_s19, %s1594_s29  ;;  %p1600_p5 = scmp.lt.s32.totalorder %s1594_s29, %s1594_s29 }
   0xd   :  { %p1601_p6 = por %p1600_p5, %p1599_p4 }
   0xf   :  { %p1602_p7 = pnand %p1601_p6, %p1595_p3 }
  0x11   :  { %1605 = shalt.err (!%p1602_p7)
}
  0x12   :  { %s1680_s30 = smov 128   ;;  %s1681_s6 = smov 8  }
  0x13   :  { %36 = dma.hbm_to_vmem [thread:$0]  %s2014_s1, 512, %s31_s19, [#allocation6], %s1680_s30, %s1680_s30, %s1681_s6  }
  0x14   :  { %s1606_s11 = scalar_lea.hbm %s2013_s0, 4864 }
  0x15   :  { %p1607_p8 = scmp.ne.s32.totalorder %s2013_s0, %s1606_s11  ;;  %p1610_p9 = scmp.lt.u32.totalorder %s1606_s11, %s2013_s0 }
  0x17   :  { %p1612_p10 = pnand %p1610_p9, %p1607_p8 }
  0x19   :  { %1615 = shalt.err (!%p1612_p10)
}
  0x1a   :  { %s1616_s16 = scalar_lea.vmem %s1714_s21, 4864  ;;  %p1621_p12 = scmp.lt.s32.totalorder %s1714_s21, %s1714_s21 }
  0x1b   :  { %p1617_p11 = scmp.ne.s32.totalorder %s1714_s21, %s1616_s16  ;;  %p1622_p13 = scmp.lt.s32.totalorder %s1616_s16, %s1616_s16 }
  0x1d   :  { %p1623_p0 = por %p1622_p13, %p1621_p12 }
  0x1f   :  { %p1624_p1 = pnand %p1623_p0, %p1617_p11 }
  0x21   :  { %1627 = shalt.err (!%p1624_p1)
}
  0x22   :  { %24 = dma.hbm_to_vmem [thread:$0]  %s2013_s0, 4864, %s1714_s21, [#allocation3], %s1680_s30, %s1680_s30, %s1681_s6  }
  0x23   :  { %s1682_s18 = smov [#allocation7]   ;;  %s1628_s23 = scalar_lea.hbm %s2016_s3, 512 }
  0x24   :  { %s44_s19 = sshll.u32 %s1682_s18, 4  ;;  %p1629_p2 = scmp.ne.s32.totalorder %s2016_s3, %s1628_s23  ;;  %s45_s19 = int_to_ptr.vmem [resolvable:$true] %s44_s19 }
  0x25   :  { %p1632_p3 = scmp.lt.u32.totalorder %s1628_s23, %s2016_s3 }
  0x27   :  { %p1634_p4 = pnand %p1632_p3, %p1629_p2 }
  0x29   :  { %1637 = shalt.err (!%p1634_p4)
}
  0x2a   :  { %s1638_s28 = scalar_lea.vmem %s45_s19, 512  ;;  %p1643_p6 = scmp.lt.s32.totalorder %s45_s19, %s45_s19 }
  0x2b   :  { %p1639_p5 = scmp.ne.s32.totalorder %s45_s19, %s1638_s28  ;;  %p1644_p7 = scmp.lt.s32.totalorder %s1638_s28, %s1638_s28 }
  0x2d   :  { %p1645_p8 = por %p1644_p7, %p1643_p6 }
  0x2f   :  { %p1646_p9 = pnand %p1645_p8, %p1639_p5 }
  0x31   :  { %1649 = shalt.err (!%p1646_p9)
}
  0x32   :  { %50 = dma.hbm_to_vmem [thread:$0]  %s2016_s3, 512, %s45_s19, [#allocation6], %s1680_s30, %s1680_s30, %s1681_s6  }
  0x33   :  { %1672 = dma.done.wait [#allocation3], 4864  }
  0x34   :  { %1673 = vsyncadd [#allocation3], 4294962432 }
  0x35   :  { %1674 = dma.done.wait [#allocation6], 1024  }
  0x36   :  { %1675 = vsyncadd [#allocation6], 4294966272  ;;  %v100_v0 = vld [vmem:[#allocation5] sm:$0xff]  ;;  %v101_v1 = vld [vmem:[#allocation5 + $0x8] sm:$0xff]  ;;  %vm415_vm0 = vcmask 261120  }
  0x37   :  { %v102_v2 = vld [vmem:[#allocation5 + $0x10] sm:$0xff]  ;;  %v1399_v3 = vpack.c.bf16 %v101_v1, %v100_v0  ;;  %v103_v4 = vld [vmem:[#allocation5 + $0x18] sm:$0xff]  ;;  %v404_v7 = vld [vmem:[#allocation7] sm:$0xff] }
  0x38   :  { %v1766_v5 = vld [vmem:[#allocation2] sm:$0xff]  ;;  %v1403_v6 = vpack.c.bf16 %v103_v4, %v102_v2  ;;  %v405_v8 = vld [vmem:[#allocation7 + $0x8] sm:$0xff]  ;;  %v1769_v10 = vld [vmem:[#allocation2 + $0x8] sm:$0xff] }
  0x39   :  { %1277 = vmatprep.mubr.f32.mxu0 %v1766_v5  ;;  %1400 = vmatprep.subr.bf16.mxu0 %v1399_v3  ;;  %v1407_v9 = vpack.c.bf16 %v405_v8, %v404_v7  ;;  %v1771_v11 = vld [vmem:[#allocation2 + $0x10] sm:$0xff]  ;;  %v1775_v12 = vld [vmem:[#allocation2 + $0x18] sm:$0xff]  ;;  %v1777_v13 = vld [vmem:[#allocation2 + $0x20] sm:$0xff] }
  0x3a   :  { %1402 = vmatpush3.bf16.xpose.msra.mxu0 %v1399_v3  ;;  %v1781_v14 = vld [vmem:[#allocation2 + $0x28] sm:$0xff]  ;;  %v1783_v15 = vld [vmem:[#allocation2 + $0x30] sm:$0xff]  ;;  %v1787_v16 = vld [vmem:[#allocation2 + $0x38] sm:$0xff] }
  0x3b   :  { %1404 = vmatprep.subr.bf16.mxu0 %v1403_v6  ;;  %1408 = vmatprep.subr.bf16.mxu1 %v1407_v9  ;;  %v1789_v17 = vld [vmem:[#allocation2 + $0x40] sm:$0xff]  ;;  %v1793_v18 = vld [vmem:[#allocation2 + $0x48] sm:$0xff]  ;;  %v1795_v19 = vld [vmem:[#allocation2 + $0x50] sm:$0xff] }
  0x3c   :  { %1410 = vmatpush3.bf16.msra.mxu1 %v1407_v9  ;;  %v1799_v20 = vld [vmem:[#allocation2 + $0x58] sm:$0xff]  ;;  %v1801_v21 = vld [vmem:[#allocation2 + $0x60] sm:$0xff]  ;;  %v1805_v22 = vld [vmem:[#allocation2 + $0x68] sm:$0xff] }
  0x3d   :  { %v1807_v23 = vld [vmem:[#allocation2 + $0x70] sm:$0xff]  ;;  %v1811_v24 = vld [vmem:[#allocation2 + $0x78] sm:$0xff]  ;;  %v1813_v25 = vld [vmem:[#allocation2 + $0x80] sm:$0xff] }
  0x3e   :  { %v1817_v26 = vld [vmem:[#allocation2 + $0x88] sm:$0xff]  ;;  %v1819_v27 = vld [vmem:[#allocation2 + $0x90] sm:$0xff]  ;;  %v1823_v28 = vld [vmem:[#allocation2 + $0x98] sm:$0xff] }
  0x3f   :  { %v1825_v29 = vld [vmem:[#allocation2 + $0xa0] sm:$0xff]  ;;  %v1829_v30 = vld [vmem:[#allocation2 + $0xa8] sm:$0xff]  ;;  %v1831_v31 = vld [vmem:[#allocation2 + $0xb0] sm:$0xff] }
  0x40   :  { %v1835_v32 = vld [vmem:[#allocation2 + $0xb8] sm:$0xff]  ;;  %v1837_v33 = vld [vmem:[#allocation2 + $0xc0] sm:$0xff]  ;;  %v1841_v34 = vld [vmem:[#allocation2 + $0xc8] sm:$0xff] }
  0x41   :  { %v88_v35 = vld [vmem:[#allocation2 + $0xd0] sm:$0xff]  ;;  %v1844_v36 = vld [vmem:[#allocation2 + $0xd8] sm:$0xff]  ;;  %v90_v37 = vld [vmem:[#allocation2 + $0xe0] sm:$0xff] }
  0x42   :  { %1406 = vmatpush3.bf16.xpose.msra.mxu0 %v1403_v6  ;;  %v91_v38 = vld [vmem:[#allocation2 + $0xe8] sm:$0xff]  ;;  %v92_v39 = vld [vmem:[#allocation2 + $0xf0] sm:$0xff]  ;;  %v93_v40 = vld [vmem:[#allocation2 + $0xf8] sm:$0xff] }
  0x43   :  { %v94_v41 = vld [vmem:[#allocation2 + $0x100] sm:$0xff]  ;;  %v95_v42 = vld [vmem:[#allocation2 + $0x108] sm:$0xff]  ;;  %v96_v43 = vld [vmem:[#allocation2 + $0x110] sm:$0xff] }
  0x44   :  { %v97_v44 = vld [vmem:[#allocation2 + $0x118] sm:$0xff]  ;;  %v98_v45 = vld [vmem:[#allocation2 + $0x120] sm:$0xff]  ;;  %v99_v46 = vld [vmem:[#allocation2 + $0x128] sm:$0xff] }
  0x45   :  { %v406_v47 = vld [vmem:[#allocation7 + $0x10] sm:$0xff]  ;;  %v407_v48 = vld [vmem:[#allocation7 + $0x18] sm:$0xff] }
  0x46   :  { %v1411_v49 = vpack.c.bf16 %v407_v48, %v406_v47  ;;  %v1850_v50 = vld [vmem:[%s2015_s2] ss:$0 sm:$0xff] }
  0x48   :  { %1412 = vmatprep.subr.bf16.mxu1 %v1411_v49 }
  0x49   :  { %1278 = vmatmul.mubr.f32.vlgmr.msra.gmra.mrb[0].mxu0 %v1769_v10  ;;  %1414 = vmatpush3.bf16.msra.mxu1 %v1411_v49 }
  0x4a   :  { %1280 = vmatprep.mubr.f32.mxu0 %v1771_v11 }
  0x4d   :  { %1281 = vmatmul.mubr.f32.gmra.mrb[2].mxu0 %v1775_v12 }
  0x4e   :  { %1283 = vmatprep.mubr.f32.mxu0 %v1777_v13 }
  0x51   :  { %1284 = vmatmul.mubr.f32.gmra.mrb[4].mxu0 %v1781_v14 }
  0x52   :  { %1286 = vmatprep.mubr.f32.mxu0 %v1783_v15 }
  0x55   :  { %1287 = vmatmul.mubr.f32.gmra.mrb[6].mxu0 %v1787_v16 }
  0x56   :  { %1289 = vmatprep.mubr.f32.mxu0 %v1789_v17 }
  0x59   :  { %1290 = vmatmul.mubr.f32.gmra.mrb[8].mxu0 %v1793_v18 }
  0x5a   :  { %1292 = vmatprep.mubr.f32.mxu0 %v1795_v19 }
  0x5d   :  { %1293 = vmatmul.mubr.f32.gmra.mrb[10].mxu0 %v1799_v20 }
  0x5e   :  { %1295 = vmatprep.mubr.f32.mxu0 %v1801_v21 }
  0x61   :  { %1296 = vmatmul.mubr.f32.gmra.mrb[12].mxu0 %v1805_v22 }
  0x62   :  { %1298 = vmatprep.mubr.f32.mxu0 %v1807_v23 }
  0x65   :  { %1299 = vmatmul.mubr.f32.gmra.mrb[14].mxu0 %v1811_v24 }
  0x66   :  { %1301 = vmatprep.mubr.f32.mxu0 %v1813_v25 }
  0x69   :  { %1302 = vmatmul.mubr.f32.gmra.mrb[16].mxu0 %v1817_v26 }
  0x6a   :  { %1304 = vmatprep.mubr.f32.mxu0 %v1819_v27 }
  0x6d   :  { %1305 = vmatmul.mubr.f32.gmra.mrb[18].mxu0 %v1823_v28 }
  0x6e   :  { %1307 = vmatprep.mubr.f32.mxu0 %v1825_v29 }
  0x71   :  { %1308 = vmatmul.mubr.f32.gmra.mrb[20].mxu0 %v1829_v30 }
  0x72   :  { %1310 = vmatprep.mubr.f32.mxu0 %v1831_v31 }
  0x75   :  { %1311 = vmatmul.mubr.f32.gmra.mrb[22].mxu0 %v1835_v32 }
  0x76   :  { %1313 = vmatprep.mubr.f32.mxu0 %v1837_v33 }
  0x79   :  { %1314 = vmatmul.mubr.f32.gmra.mrb[24].mxu0 %v1841_v34 }
  0x7a   :  { %1316 = vmatprep.mubr.f32.mxu0 %v88_v35 }
  0x7d   :  { %1317 = vmatmul.mubr.f32.gmra.mrb[26].mxu0 %v1844_v36 }
  0x7e   :  { %1319 = vmatprep.mubr.f32.mxu0 %v90_v37 }
  0x81   :  { %1320 = vmatmul.mubr.f32.gmra.mrb[28].mxu0 %v91_v38 }
  0x82   :  { %1322 = vmatprep.mubr.f32.mxu0 %v92_v39 }
  0x85   :  { %1323 = vmatmul.mubr.f32.gmra.mrb[30].mxu0 %v93_v40 }
  0x86   :  { %1325 = vmatprep.mubr.f32.mxu0 %v94_v41 }
  0x89   :  { %1326 = vmatmul.mubr.f32.gmra.mrb[32].mxu0 %v95_v42 }
  0x8a   :  { %1328 = vmatprep.mubr.f32.mxu0 %v96_v43 }
  0x8d   :  { %1329 = vmatmul.mubr.f32.gmra.mrb[34].mxu0 %v97_v44 }
  0x8e   :  { %1331 = vmatprep.mubr.f32.mxu0 %v98_v45 }
  0x91   :  { %1332 = vmatmul.mubr.f32.gmra.mrb[36].mxu0 %v99_v46 }
 0x11c   :  { %v1279_v51 = vpop.f32.mrb[0].mxu0 }
 0x11d   :  { %v183_v52 = vadd.f32 %v1279_v51, %v1850_v50  ;;  %v177_v53 = vpop.f32.mrb[1].mxu0 }
 0x11e   :  { %v178_v54 = vadd.f32 %v1850_v50, %v177_v53 }
 0x11f   :  { %v367_v57 = vmax.f32 %v183_v52, 0.0 }
 0x120   :  { %v366_v55 = vmax.f32 %v178_v54, 0.0  ;;  %v1282_v56 = vpop.f32.mrb[2].mxu0 }
 0x121   :  { %v193_v58 = vadd.f32 %v1282_v56, %v1850_v50  ;;  %v187_v59 = vpop.f32.mrb[3].mxu0 }
 0x122   :  { %v188_v60 = vadd.f32 %v1850_v50, %v187_v59  ;;  %1342 = vmatprep.mubr.msk.f32.mxu1 %vm415_vm0, %v366_v55 }
 0x123   :  { %1343 = vmatmul.mubr.msk.f32.vlgmr.msra.gmra.mrb[0].mxu1 %vm415_vm0, %v367_v57  ;;  %v369_v63 = vmax.f32 %v193_v58, 0.0 }
 0x124   :  { %v368_v61 = vmax.f32 %v188_v60, 0.0  ;;  %v1285_v62 = vpop.f32.mrb[4].mxu0 }
 0x125   :  { %v203_v0 = vadd.f32 %v1285_v62, %v1850_v50  ;;  %v197_v1 = vpop.f32.mrb[5].mxu0 }
 0x126   :  { %v198_v2 = vadd.f32 %v1850_v50, %v197_v1  ;;  %1345 = vmatprep.mubr.msk.f32.mxu1 %vm415_vm0, %v368_v61 }
 0x127   :  { %1346 = vmatmul.mubr.msk.f32.gmra.mrb[2].mxu1 %vm415_vm0, %v369_v63  ;;  %v371_v6 = vmax.f32 %v203_v0, 0.0 }
 0x128   :  { %v370_v3 = vmax.f32 %v198_v2, 0.0  ;;  %v1288_v4 = vpop.f32.mrb[6].mxu0 }
 0x129   :  { %v213_v7 = vadd.f32 %v1288_v4, %v1850_v50  ;;  %v207_v8 = vpop.f32.mrb[7].mxu0 }
 0x12a   :  { %v208_v9 = vadd.f32 %v1850_v50, %v207_v8  ;;  %1348 = vmatprep.mubr.msk.f32.mxu1 %vm415_vm0, %v370_v3 }
 0x12b   :  { %1349 = vmatmul.mubr.msk.f32.gmra.mrb[4].mxu1 %vm415_vm0, %v371_v6  ;;  %v373_v38 = vmax.f32 %v213_v7, 0.0 }
 0x12c   :  { %v372_v35 = vmax.f32 %v208_v9, 0.0  ;;  %v1291_v37 = vpop.f32.mrb[8].mxu0 }
 0x12d   :  { %v223_v39 = vadd.f32 %v1291_v37, %v1850_v50  ;;  %v217_v40 = vpop.f32.mrb[9].mxu0 }
 0x12e   :  { %v218_v41 = vadd.f32 %v1850_v50, %v217_v40  ;;  %1351 = vmatprep.mubr.msk.f32.mxu1 %vm415_vm0, %v372_v35 }
 0x12f   :  { %1352 = vmatmul.mubr.msk.f32.gmra.mrb[6].mxu1 %vm415_vm0, %v373_v38  ;;  %v375_v44 = vmax.f32 %v223_v39, 0.0 }
 0x130   :  { %v374_v42 = vmax.f32 %v218_v41, 0.0  ;;  %v1294_v43 = vpop.f32.mrb[10].mxu0 }
 0x131   :  { %v233_v45 = vadd.f32 %v1294_v43, %v1850_v50  ;;  %v227_v46 = vpop.f32.mrb[11].mxu0 }
 0x132   :  { %v228_v47 = vadd.f32 %v1850_v50, %v227_v46  ;;  %1354 = vmatprep.mubr.msk.f32.mxu1 %vm415_vm0, %v374_v42 }
 0x133   :  { %1355 = vmatmul.mubr.msk.f32.gmra.mrb[8].mxu1 %vm415_vm0, %v375_v44  ;;  %v377_v51 = vmax.f32 %v233_v45, 0.0 }
 0x134   :  { %v376_v48 = vmax.f32 %v228_v47, 0.0  ;;  %v1297_v49 = vpop.f32.mrb[12].mxu0 }
 0x135   :  { %v243_v52 = vadd.f32 %v1297_v49, %v1850_v50  ;;  %v237_v53 = vpop.f32.mrb[13].mxu0 }
 0x136   :  { %v238_v54 = vadd.f32 %v1850_v50, %v237_v53  ;;  %1357 = vmatprep.mubr.msk.f32.mxu1 %vm415_vm0, %v376_v48 }
 0x137   :  { %1358 = vmatmul.mubr.msk.f32.gmra.mrb[10].mxu1 %vm415_vm0, %v377_v51  ;;  %v379_v57 = vmax.f32 %v243_v52, 0.0 }
 0x138   :  { %v378_v55 = vmax.f32 %v238_v54, 0.0  ;;  %v1300_v56 = vpop.f32.mrb[14].mxu0 }
 0x139   :  { %v253_v58 = vadd.f32 %v1300_v56, %v1850_v50  ;;  %v247_v59 = vpop.f32.mrb[15].mxu0 }
 0x13a   :  { %v248_v60 = vadd.f32 %v1850_v50, %v247_v59  ;;  %1360 = vmatprep.mubr.msk.f32.mxu1 %vm415_vm0, %v378_v55 }
 0x13b   :  { %1361 = vmatmul.mubr.msk.f32.gmra.mrb[12].mxu1 %vm415_vm0, %v379_v57  ;;  %v381_v63 = vmax.f32 %v253_v58, 0.0 }
 0x13c   :  { %v380_v61 = vmax.f32 %v248_v60, 0.0  ;;  %v1303_v62 = vpop.f32.mrb[16].mxu0 }
 0x13d   :  { %v263_v0 = vadd.f32 %v1303_v62, %v1850_v50  ;;  %v257_v1 = vpop.f32.mrb[17].mxu0 }
 0x13e   :  { %v258_v2 = vadd.f32 %v1850_v50, %v257_v1  ;;  %1363 = vmatprep.mubr.msk.f32.mxu1 %vm415_vm0, %v380_v61 }
 0x13f   :  { %1364 = vmatmul.mubr.msk.f32.gmra.mrb[14].mxu1 %vm415_vm0, %v381_v63  ;;  %v383_v6 = vmax.f32 %v263_v0, 0.0 }
 0x140   :  { %v382_v3 = vmax.f32 %v258_v2, 0.0  ;;  %v1306_v4 = vpop.f32.mrb[18].mxu0 }
 0x141   :  { %v273_v7 = vadd.f32 %v1306_v4, %v1850_v50  ;;  %v267_v8 = vpop.f32.mrb[19].mxu0 }
 0x142   :  { %v268_v9 = vadd.f32 %v1850_v50, %v267_v8  ;;  %1366 = vmatprep.mubr.msk.f32.mxu1 %vm415_vm0, %v382_v3 }
 0x143   :  { %1367 = vmatmul.mubr.msk.f32.gmra.mrb[16].mxu1 %vm415_vm0, %v383_v6  ;;  %v385_v38 = vmax.f32 %v273_v7, 0.0 }
 0x144   :  { %v384_v35 = vmax.f32 %v268_v9, 0.0  ;;  %v1309_v37 = vpop.f32.mrb[20].mxu0 }
 0x145   :  { %v283_v39 = vadd.f32 %v1309_v37, %v1850_v50  ;;  %v277_v40 = vpop.f32.mrb[21].mxu0 }
 0x146   :  { %v278_v41 = vadd.f32 %v1850_v50, %v277_v40  ;;  %1369 = vmatprep.mubr.msk.f32.mxu1 %vm415_vm0, %v384_v35 }
 0x147   :  { %1370 = vmatmul.mubr.msk.f32.gmra.mrb[18].mxu1 %vm415_vm0, %v385_v38  ;;  %v387_v44 = vmax.f32 %v283_v39, 0.0 }
 0x148   :  { %v386_v42 = vmax.f32 %v278_v41, 0.0  ;;  %v1312_v43 = vpop.f32.mrb[22].mxu0 }
 0x149   :  { %v293_v45 = vadd.f32 %v1312_v43, %v1850_v50  ;;  %v287_v46 = vpop.f32.mrb[23].mxu0 }
 0x14a   :  { %v288_v47 = vadd.f32 %v1850_v50, %v287_v46  ;;  %1372 = vmatprep.mubr.msk.f32.mxu1 %vm415_vm0, %v386_v42 }
 0x14b   :  { %1373 = vmatmul.mubr.msk.f32.gmra.mrb[20].mxu1 %vm415_vm0, %v387_v44  ;;  %v389_v51 = vmax.f32 %v293_v45, 0.0 }
 0x14c   :  { %v388_v48 = vmax.f32 %v288_v47, 0.0  ;;  %v1315_v49 = vpop.f32.mrb[24].mxu0 }
 0x14d   :  { %v303_v52 = vadd.f32 %v1315_v49, %v1850_v50  ;;  %v297_v53 = vpop.f32.mrb[25].mxu0 }
 0x14e   :  { %v298_v54 = vadd.f32 %v1850_v50, %v297_v53  ;;  %1375 = vmatprep.mubr.msk.f32.mxu1 %vm415_vm0, %v388_v48 }
 0x14f   :  { %1376 = vmatmul.mubr.msk.f32.gmra.mrb[22].mxu1 %vm415_vm0, %v389_v51  ;;  %v391_v57 = vmax.f32 %v303_v52, 0.0 }
 0x150   :  { %v390_v55 = vmax.f32 %v298_v54, 0.0  ;;  %v1318_v56 = vpop.f32.mrb[26].mxu0 }
 0x151   :  { %v313_v58 = vadd.f32 %v1318_v56, %v1850_v50  ;;  %v307_v59 = vpop.f32.mrb[27].mxu0 }
 0x152   :  { %v308_v60 = vadd.f32 %v1850_v50, %v307_v59  ;;  %1378 = vmatprep.mubr.msk.f32.mxu1 %vm415_vm0, %v390_v55 }
 0x153   :  { %1379 = vmatmul.mubr.msk.f32.gmra.mrb[24].mxu1 %vm415_vm0, %v391_v57  ;;  %v393_v63 = vmax.f32 %v313_v58, 0.0  ;;  %v1931_v57 = vld [vmem:[%s2017_s4] ss:$0 sm:$0xff]  ;;  %s1683_s4 = smov [#allocation8]  }
 0x154   :  { %v392_v61 = vmax.f32 %v308_v60, 0.0  ;;  %v1321_v62 = vpop.f32.mrb[28].mxu0  ;;  %s1094_s8 = sshll.u32 %s1683_s4, 4  ;;  %s1095_s8 = int_to_ptr.vmem [resolvable:$true] %s1094_s8 }
 0x155   :  { %v323_v0 = vadd.f32 %v1321_v62, %v1850_v50  ;;  %v317_v1 = vpop.f32.mrb[29].mxu0  ;;  %s1650_s9 = scalar_lea.vmem %s1095_s8, 4864  ;;  %p1655_p11 = scmp.lt.s32.totalorder %s1095_s8, %s1095_s8 }
 0x156   :  { %v318_v2 = vadd.f32 %v1850_v50, %v317_v1  ;;  %1381 = vmatprep.mubr.msk.f32.mxu1 %vm415_vm0, %v392_v61  ;;  %p1651_p10 = scmp.ne.s32.totalorder %s1095_s8, %s1650_s9  ;;  %p1656_p12 = scmp.lt.s32.totalorder %s1650_s9, %s1650_s9 }
 0x157   :  { %1382 = vmatmul.mubr.msk.f32.gmra.mrb[26].mxu1 %vm415_vm0, %v393_v63  ;;  %v395_v6 = vmax.f32 %v323_v0, 0.0 }
 0x158   :  { %v394_v3 = vmax.f32 %v318_v2, 0.0  ;;  %v1324_v4 = vpop.f32.mrb[30].mxu0  ;;  %p1657_p13 = por %p1656_p12, %p1655_p11 }
 0x159   :  { %v333_v7 = vadd.f32 %v1324_v4, %v1850_v50  ;;  %v327_v8 = vpop.f32.mrb[31].mxu0 }
 0x15a   :  { %v328_v9 = vadd.f32 %v1850_v50, %v327_v8  ;;  %1384 = vmatprep.mubr.msk.f32.mxu1 %vm415_vm0, %v394_v3  ;;  %p1658_p0 = pnand %p1657_p13, %p1651_p10 }
 0x15b   :  { %1385 = vmatmul.mubr.msk.f32.gmra.mrb[28].mxu1 %vm415_vm0, %v395_v6  ;;  %v397_v38 = vmax.f32 %v333_v7, 0.0 }
 0x15c   :  { %v396_v35 = vmax.f32 %v328_v9, 0.0  ;;  %v1327_v37 = vpop.f32.mrb[32].mxu0 }
 0x15d   :  { %v343_v39 = vadd.f32 %v1327_v37, %v1850_v50  ;;  %v337_v40 = vpop.f32.mrb[33].mxu0 }
 0x15e   :  { %v338_v41 = vadd.f32 %v1850_v50, %v337_v40  ;;  %1387 = vmatprep.mubr.msk.f32.mxu1 %vm415_vm0, %v396_v35 }
 0x15f   :  { %1388 = vmatmul.mubr.msk.f32.gmra.mrb[30].mxu1 %vm415_vm0, %v397_v38  ;;  %v399_v44 = vmax.f32 %v343_v39, 0.0 }
 0x160   :  { %v398_v42 = vmax.f32 %v338_v41, 0.0  ;;  %v1330_v43 = vpop.f32.mrb[34].mxu0 }
 0x161   :  { %v353_v45 = vadd.f32 %v1330_v43, %v1850_v50  ;;  %v347_v46 = vpop.f32.mrb[35].mxu0 }
 0x162   :  { %v348_v47 = vadd.f32 %v1850_v50, %v347_v46  ;;  %1390 = vmatprep.mubr.msk.f32.mxu1 %vm415_vm0, %v398_v42 }
 0x163   :  { %1391 = vmatmul.mubr.msk.f32.gmra.mrb[32].mxu1 %vm415_vm0, %v399_v44  ;;  %v401_v51 = vmax.f32 %v353_v45, 0.0 }
 0x164   :  { %v400_v48 = vmax.f32 %v348_v47, 0.0  ;;  %v1333_v49 = vpop.f32.mrb[36].mxu0 }
 0x165   :  { %v363_v52 = vadd.f32 %v1333_v49, %v1850_v50  ;;  %v357_v53 = vpop.f32.mrb[37].mxu0 }
 0x166   :  { %v358_v54 = vadd.f32 %v1850_v50, %v357_v53  ;;  %1393 = vmatprep.mubr.msk.f32.mxu1 %vm415_vm0, %v400_v48 }
 0x167   :  { %1394 = vmatmul.mubr.msk.f32.gmra.mrb[34].mxu1 %vm415_vm0, %v401_v51  ;;  %v403_v56 = vmax.f32 %v363_v52, 0.0 }
 0x168   :  { %v402_v55 = vmax.f32 %v358_v54, 0.0 }
 0x16a   :  { %1396 = vmatprep.mubr.msk.f32.mxu1 %vm415_vm0, %v402_v55 }
 0x16b   :  { %1397 = vmatmul.mubr.msk.f32.gmra.mrb[36].mxu1 %vm415_vm0, %v403_v56 }
 0x1f6   :  { %v1344_v58 = vpop.f32.mrb[0].mxu1 }
 0x1f7   :  { %v602_v59 = vadd.f32 %v1344_v58, %v1931_v57  ;;  %v596_v60 = vpop.f32.mrb[1].mxu1 }
 0x1f8   :  { %v597_v50 = vadd.f32 %v1931_v57, %v596_v60 }
 0x1f9   :  { %v1148_v61 = vmul.f32 -1.442695, %v602_v59 }
 0x1fa   :  { %v1147_v62 = vmul.f32 -1.442695, %v597_v50  ;;  %v1347_v63 = vpop.f32.mrb[2].mxu1 }
 0x1fb   :  { %1421 = vpow2.f32 %v1148_v61  ;;  %v612_v0 = vadd.f32 %v1347_v63, %v1931_v57  ;;  %v606_v1 = vpop.f32.mrb[3].mxu1 }
 0x1fc   :  { %1423 = vpow2.f32 %v1147_v62  ;;  %v607_v2 = vadd.f32 %v1931_v57, %v606_v1 }
 0x1fd   :  { %v1150_v3 = vmul.f32 -1.442695, %v612_v0 }
 0x1fe   :  { %v1149_v4 = vmul.f32 -1.442695, %v607_v2  ;;  %v1350_v6 = vpop.f32.mrb[4].mxu1 }
 0x1ff   :  { %1425 = vpow2.f32 %v1150_v3  ;;  %v622_v7 = vadd.f32 %v1350_v6, %v1931_v57  ;;  %v616_v8 = vpop.f32.mrb[5].mxu1 }
 0x200   :  { %1427 = vpow2.f32 %v1149_v4  ;;  %v617_v9 = vadd.f32 %v1931_v57, %v616_v8 }
 0x201   :  { %v1152_v35 = vmul.f32 -1.442695, %v622_v7 }
 0x202   :  { %v1151_v37 = vmul.f32 -1.442695, %v617_v9  ;;  %v1353_v38 = vpop.f32.mrb[6].mxu1 }
 0x203   :  { %1429 = vpow2.f32 %v1152_v35  ;;  %v632_v39 = vadd.f32 %v1353_v38, %v1931_v57  ;;  %v626_v40 = vpop.f32.mrb[7].mxu1 }
 0x204   :  { %1431 = vpow2.f32 %v1151_v37  ;;  %v627_v41 = vadd.f32 %v1931_v57, %v626_v40 }
 0x205   :  { %v1422_v42 = vpop.eup %1421  ;;  %v1154_v43 = vmul.f32 -1.442695, %v632_v39 }
 0x206   :  { %v1424_v44 = vpop.eup %1423  ;;  %v900_v45 = vadd.f32 1.0, %v1422_v42  ;;  %v1153_v46 = vmul.f32 -1.442695, %v627_v41  ;;  %v1356_v47 = vpop.f32.mrb[8].mxu1 }
 0x207   :  { %v899_v48 = vadd.f32 1.0, %v1424_v44  ;;  %1433 = vpow2.f32 %v1154_v43  ;;  %v642_v49 = vadd.f32 %v1356_v47, %v1931_v57  ;;  %v636_v51 = vpop.f32.mrb[9].mxu1 }
 0x208   :  { %1435 = vrcp.f32 %v900_v45  ;;  %v637_v52 = vadd.f32 %v1931_v57, %v636_v51 }
 0x209   :  { %v1426_v53 = vpop.eup %1425  ;;  %1437 = vrcp.f32 %v899_v48  ;;  %v1156_v54 = vmul.f32 -1.442695, %v642_v49 }
 0x20a   :  { %v1428_v55 = vpop.eup %1427  ;;  %v902_v56 = vadd.f32 1.0, %v1426_v53  ;;  %1439 = vpow2.f32 %v1153_v46  ;;  %v1155_v58 = vmul.f32 -1.442695, %v637_v52  ;;  %v1359_v59 = vpop.f32.mrb[10].mxu1 }
 0x20b   :  { %v901_v60 = vadd.f32 1.0, %v1428_v55  ;;  %1441 = vpow2.f32 %v1156_v54  ;;  %v652_v50 = vadd.f32 %v1359_v59, %v1931_v57  ;;  %v646_v61 = vpop.f32.mrb[11].mxu1 }
 0x20c   :  { %1443 = vrcp.f32 %v902_v56  ;;  %v647_v62 = vadd.f32 %v1931_v57, %v646_v61 }
 0x20d   :  { %v1430_v63 = vpop.eup %1429  ;;  %1445 = vrcp.f32 %v901_v60  ;;  %v1158_v0 = vmul.f32 -1.442695, %v652_v50 }
 0x20e   :  { %v1432_v1 = vpop.eup %1431  ;;  %v904_v2 = vadd.f32 1.0, %v1430_v63  ;;  %1447 = vpow2.f32 %v1155_v58  ;;  %v1157_v3 = vmul.f32 -1.442695, %v647_v62  ;;  %v1362_v4 = vpop.f32.mrb[12].mxu1 }
 0x20f   :  { %v903_v6 = vadd.f32 1.0, %v1432_v1  ;;  %1449 = vpow2.f32 %v1158_v0  ;;  %v662_v7 = vadd.f32 %v1362_v4, %v1931_v57  ;;  %v656_v8 = vpop.f32.mrb[13].mxu1 }
 0x210   :  { %1451 = vrcp.f32 %v904_v2  ;;  %v657_v9 = vadd.f32 %v1931_v57, %v656_v8 }
 0x211   :  { %v1434_v35 = vpop.eup %1433  ;;  %1453 = vrcp.f32 %v903_v6  ;;  %v1160_v37 = vmul.f32 -1.442695, %v662_v7 }
 0x212   :  { %v1436_v38 = vpop.eup %1435  ;;  %v906_v39 = vadd.f32 1.0, %v1434_v35  ;;  %1455 = vpow2.f32 %v1157_v3  ;;  %v1159_v40 = vmul.f32 -1.442695, %v657_v9  ;;  %v1365_v41 = vpop.f32.mrb[14].mxu1 }
 0x213   :  { %v1438_v42 = vpop.eup %1437  ;;  %v1014_v43 = vmul.f32 %v1436_v38, %v1769_v10  ;;  %1457 = vpow2.f32 %v1160_v37  ;;  %v672_v44 = vadd.f32 %v1365_v41, %v1931_v57  ;;  %v666_v45 = vpop.f32.mrb[15].mxu1 }
 0x214   :  { %v1440_v46 = vpop.eup %1439  ;;  %v1013_v47 = vmul.f32 %v1438_v42, %v1766_v5  ;;  %1459 = vrcp.f32 %v906_v39  ;;  %v667_v48 = vadd.f32 %v1931_v57, %v666_v45 }
 0x215   :  { %v1442_v49 = vpop.eup %1441  ;;  %1052 = vst [vmem:[#allocation8 + $0x8] sm:$0xff] %v1014_v43  ;;  %v905_v51 = vadd.f32 1.0, %v1440_v46  ;;  %1461 = vpow2.f32 %v1159_v40  ;;  %v1162_v52 = vmul.f32 -1.442695, %v672_v44 }
 0x216   :  { %v1444_v53 = vpop.eup %1443  ;;  %1051 = vst [vmem:[#allocation8] sm:$0xff] %v1013_v47  ;;  %v908_v54 = vadd.f32 1.0, %v1442_v49  ;;  %v1161_v55 = vmul.f32 -1.442695, %v667_v48  ;;  %v1368_v10 = vpop.f32.mrb[16].mxu1 }
 0x217   :  { %v1446_v56 = vpop.eup %1445  ;;  %v1016_v58 = vmul.f32 %v1444_v53, %v1775_v12  ;;  %1463 = vrcp.f32 %v905_v51  ;;  %v682_v59 = vadd.f32 %v1368_v10, %v1931_v57  ;;  %v676_v5 = vpop.f32.mrb[17].mxu1 }
 0x218   :  { %v1448_v60 = vpop.eup %1447  ;;  %v1015_v50 = vmul.f32 %v1446_v56, %v1771_v11  ;;  %1465 = vrcp.f32 %v908_v54  ;;  %v677_v61 = vadd.f32 %v1931_v57, %v676_v5 }
 0x219   :  { %v1450_v62 = vpop.eup %1449  ;;  %1054 = vst [vmem:[#allocation8 + $0x18] sm:$0xff] %v1016_v58  ;;  %v907_v63 = vadd.f32 1.0, %v1448_v60  ;;  %1467 = vpow2.f32 %v1162_v52  ;;  %v1164_v0 = vmul.f32 -1.442695, %v682_v59 }
 0x21a   :  { %v1452_v1 = vpop.eup %1451  ;;  %1053 = vst [vmem:[#allocation8 + $0x10] sm:$0xff] %v1015_v50  ;;  %v910_v2 = vadd.f32 1.0, %v1450_v62  ;;  %1469 = vpow2.f32 %v1161_v55  ;;  %v1163_v12 = vmul.f32 -1.442695, %v677_v61  ;;  %v1371_v3 = vpop.f32.mrb[18].mxu1 }
 0x21b   :  { %v1454_v4 = vpop.eup %1453  ;;  %v1018_v6 = vmul.f32 %v1452_v1, %v1781_v14  ;;  %1471 = vrcp.f32 %v907_v63  ;;  %v692_v11 = vadd.f32 %v1371_v3, %v1931_v57  ;;  %v686_v7 = vpop.f32.mrb[19].mxu1 }
 0x21c   :  { %v1456_v8 = vpop.eup %1455  ;;  %v1017_v9 = vmul.f32 %v1454_v4, %v1777_v13  ;;  %1473 = vrcp.f32 %v910_v2  ;;  %v687_v35 = vadd.f32 %v1931_v57, %v686_v7 }
 0x21d   :  { %v1458_v37 = vpop.eup %1457  ;;  %1056 = vst [vmem:[#allocation8 + $0x28] sm:$0xff] %v1018_v6  ;;  %v909_v38 = vadd.f32 1.0, %v1456_v8  ;;  %1475 = vpow2.f32 %v1164_v0  ;;  %v1166_v39 = vmul.f32 -1.442695, %v692_v11 }
 0x21e   :  { %v1460_v40 = vpop.eup %1459  ;;  %1055 = vst [vmem:[#allocation8 + $0x20] sm:$0xff] %v1017_v9  ;;  %v912_v41 = vadd.f32 1.0, %v1458_v37  ;;  %1477 = vpow2.f32 %v1163_v12  ;;  %v1374_v14 = vpop.f32.mrb[20].mxu1  ;;  %v1165_v44 = vmul.f32 -1.442695, %v687_v35 }
 0x21f   :  { %v1462_v42 = vpop.eup %1461  ;;  %v1020_v43 = vmul.f32 %v1460_v40, %v1787_v16  ;;  %1479 = vrcp.f32 %v909_v38  ;;  %v702_v13 = vadd.f32 %v1374_v14, %v1931_v57  ;;  %v696_v45 = vpop.f32.mrb[21].mxu1 }
 0x220   :  { %1481 = vrcp.f32 %v912_v41  ;;  %v911_v46 = vadd.f32 1.0, %v1462_v42  ;;  %v697_v47 = vadd.f32 %v1931_v57, %v696_v45 }
 0x221   :  { %v1464_v48 = vpop.eup %1463  ;;  %1058 = vst [vmem:[#allocation8 + $0x38] sm:$0xff] %v1020_v43  ;;  %1483 = vpow2.f32 %v1166_v39  ;;  %v1168_v49 = vmul.f32 -1.442695, %v702_v13 }
 0x222   :  { %v1466_v51 = vpop.eup %1465  ;;  %v1019_v52 = vmul.f32 %v1464_v48, %v1783_v15  ;;  %1485 = vrcp.f32 %v911_v46  ;;  %v1167_v53 = vmul.f32 -1.442695, %v697_v47  ;;  %v1377_v54 = vpop.f32.mrb[22].mxu1 }
 0x223   :  { %v1468_v16 = vpop.eup %1467  ;;  %v1022_v55 = vmul.f32 %v1466_v51, %v1793_v18  ;;  %1487 = vpow2.f32 %v1165_v44  ;;  %v712_v10 = vadd.f32 %v1377_v54, %v1931_v57  ;;  %v706_v56 = vpop.f32.mrb[23].mxu1 }
 0x224   :  { %v1470_v58 = vpop.eup %1469  ;;  %1057 = vst [vmem:[#allocation8 + $0x30] sm:$0xff] %v1019_v52  ;;  %v914_v59 = vadd.f32 1.0, %v1468_v16  ;;  %1489 = vpow2.f32 %v1168_v49  ;;  %v707_v5 = vadd.f32 %v1931_v57, %v706_v56 }
 0x225   :  { %v1472_v60 = vpop.eup %1471  ;;  %1060 = vst [vmem:[#allocation8 + $0x48] sm:$0xff] %v1022_v55  ;;  %v913_v50 = vadd.f32 1.0, %v1470_v58  ;;  %1491 = vpow2.f32 %v1167_v53  ;;  %v1170_v15 = vmul.f32 -1.442695, %v712_v10 }
 0x226   :  { %v1474_v61 = vpop.eup %1473  ;;  %v1021_v62 = vmul.f32 %v1472_v60, %v1789_v17  ;;  %1493 = vrcp.f32 %v914_v59  ;;  %v1169_v18 = vmul.f32 -1.442695, %v707_v5  ;;  %v1380_v63 = vpop.f32.mrb[24].mxu1 }
 0x227   :  { %v1476_v0 = vpop.eup %1475  ;;  %v1024_v1 = vmul.f32 %v1474_v61, %v1799_v20  ;;  %1495 = vrcp.f32 %v913_v50  ;;  %v722_v2 = vadd.f32 %v1380_v63, %v1931_v57  ;;  %v716_v12 = vpop.f32.mrb[25].mxu1 }
 0x228   :  { %v1478_v3 = vpop.eup %1477  ;;  %1059 = vst [vmem:[#allocation8 + $0x40] sm:$0xff] %v1021_v62  ;;  %v916_v4 = vadd.f32 1.0, %v1476_v0  ;;  %1497 = vpow2.f32 %v1170_v15  ;;  %v717_v6 = vadd.f32 %v1931_v57, %v716_v12 }
 0x229   :  { %v1480_v11 = vpop.eup %1479  ;;  %1062 = vst [vmem:[#allocation8 + $0x58] sm:$0xff] %v1024_v1  ;;  %v915_v7 = vadd.f32 1.0, %v1478_v3  ;;  %1499 = vpow2.f32 %v1169_v18  ;;  %v1172_v17 = vmul.f32 -1.442695, %v722_v2 }
 0x22a   :  { %v1482_v8 = vpop.eup %1481  ;;  %v1023_v9 = vmul.f32 %v1480_v11, %v1795_v19  ;;  %1501 = vrcp.f32 %v916_v4  ;;  %v1171_v20 = vmul.f32 -1.442695, %v717_v6  ;;  %v1383_v35 = vpop.f32.mrb[26].mxu1 }
 0x22b   :  { %v1484_v37 = vpop.eup %1483  ;;  %v1026_v38 = vmul.f32 %v1482_v8, %v1805_v22  ;;  %1503 = vrcp.f32 %v915_v7  ;;  %v732_v39 = vadd.f32 %v1383_v35, %v1931_v57  ;;  %v726_v40 = vpop.f32.mrb[27].mxu1 }
 0x22c   :  { %v1486_v41 = vpop.eup %1485  ;;  %1061 = vst [vmem:[#allocation8 + $0x50] sm:$0xff] %v1023_v9  ;;  %v918_v14 = vadd.f32 1.0, %v1484_v37  ;;  %1505 = vpow2.f32 %v1172_v17  ;;  %v727_v42 = vadd.f32 %v1931_v57, %v726_v40 }
 0x22d   :  { %v1488_v43 = vpop.eup %1487  ;;  %1064 = vst [vmem:[#allocation8 + $0x68] sm:$0xff] %v1026_v38  ;;  %v1025_v19 = vmul.f32 %v1486_v41, %v1801_v21  ;;  %1507 = vpow2.f32 %v1171_v20  ;;  %v1174_v44 = vmul.f32 -1.442695, %v732_v39 }
 0x22e   :  { %v1490_v13 = vpop.eup %1489  ;;  %1509 = vrcp.f32 %v918_v14  ;;  %v917_v45 = vadd.f32 1.0, %v1488_v43  ;;  %v1386_v22 = vpop.f32.mrb[28].mxu1  ;;  %v1173_v48 = vmul.f32 -1.442695, %v727_v42 }
 0x22f   :  { %v1492_v46 = vpop.eup %1491  ;;  %1063 = vst [vmem:[#allocation8 + $0x60] sm:$0xff] %v1025_v19  ;;  %v920_v47 = vadd.f32 1.0, %v1490_v13  ;;  %1511 = vpow2.f32 %v1174_v44  ;;  %v742_v49 = vadd.f32 %v1386_v22, %v1931_v57  ;;  %v736_v51 = vpop.f32.mrb[29].mxu1 }
 0x230   :  { %v1494_v52 = vpop.eup %1493  ;;  %1513 = vrcp.f32 %v917_v45  ;;  %v919_v53 = vadd.f32 1.0, %v1492_v46  ;;  %v737_v54 = vadd.f32 %v1931_v57, %v736_v51 }
 0x231   :  { %v1496_v21 = vpop.eup %1495  ;;  %v1028_v16 = vmul.f32 %v1494_v52, %v1811_v24  ;;  %1515 = vrcp.f32 %v920_v47  ;;  %v1176_v55 = vmul.f32 -1.442695, %v742_v49 }
 0x232   :  { %v1498_v10 = vpop.eup %1497  ;;  %v1027_v56 = vmul.f32 %v1496_v21, %v1807_v23  ;;  %1517 = vrcp.f32 %v919_v53  ;;  %v1389_v58 = vpop.f32.mrb[30].mxu1  ;;  %v1175_v60 = vmul.f32 -1.442695, %v737_v54 }
 0x233   :  { %v1500_v59 = vpop.eup %1499  ;;  %1066 = vst [vmem:[#allocation8 + $0x78] sm:$0xff] %v1028_v16  ;;  %v922_v5 = vadd.f32 1.0, %v1498_v10  ;;  %1519 = vpow2.f32 %v1173_v48  ;;  %v752_v50 = vadd.f32 %v1389_v58, %v1931_v57  ;;  %v746_v15 = vpop.f32.mrb[31].mxu1 }
 0x234   :  { %v1502_v61 = vpop.eup %1501  ;;  %1065 = vst [vmem:[#allocation8 + $0x70] sm:$0xff] %v1027_v56  ;;  %v921_v62 = vadd.f32 1.0, %v1500_v59  ;;  %1521 = vpow2.f32 %v1176_v55  ;;  %v747_v24 = vadd.f32 %v1931_v57, %v746_v15 }
 0x235   :  { %v1504_v18 = vpop.eup %1503  ;;  %v1030_v63 = vmul.f32 %v1502_v61, %v1817_v26  ;;  %1523 = vrcp.f32 %v922_v5  ;;  %v1178_v23 = vmul.f32 -1.442695, %v752_v50 }
 0x236   :  { %v1506_v0 = vpop.eup %1505  ;;  %v1029_v1 = vmul.f32 %v1504_v18, %v1813_v25  ;;  %1525 = vrcp.f32 %v921_v62  ;;  %v1392_v2 = vpop.f32.mrb[32].mxu1  ;;  %v1177_v4 = vmul.f32 -1.442695, %v747_v24 }
 0x237   :  { %v1508_v12 = vpop.eup %1507  ;;  %1068 = vst [vmem:[#allocation8 + $0x88] sm:$0xff] %v1030_v63  ;;  %v924_v3 = vadd.f32 1.0, %v1506_v0  ;;  %1527 = vpow2.f32 %v1175_v60  ;;  %v762_v6 = vadd.f32 %v1392_v2, %v1931_v57  ;;  %v756_v11 = vpop.f32.mrb[33].mxu1  ;;  %v1574_v2 = vld [vmem:[#allocation2 + $0xe8] sm:$0xff] }
 0x238   :  { %v1510_v7 = vpop.eup %1509  ;;  %1067 = vst [vmem:[#allocation8 + $0x80] sm:$0xff] %v1029_v1  ;;  %v923_v17 = vadd.f32 1.0, %v1508_v12  ;;  %1529 = vpow2.f32 %v1178_v23  ;;  %v757_v26 = vadd.f32 %v1931_v57, %v756_v11 }
 0x239   :  { %v1512_v8 = vpop.eup %1511  ;;  %v1032_v9 = vmul.f32 %v1510_v7, %v1823_v28  ;;  %1531 = vrcp.f32 %v924_v3  ;;  %v1180_v25 = vmul.f32 -1.442695, %v762_v6  ;;  %v1575_v7 = vld [vmem:[#allocation2 + $0xe0] sm:$0xff] }
 0x23a   :  { %v1514_v20 = vpop.eup %1513  ;;  %1533 = vrcp.f32 %v923_v17  ;;  %v926_v35 = vadd.f32 1.0, %v1512_v8  ;;  %v1179_v37 = vmul.f32 -1.442695, %v757_v26  ;;  %v1395_v38 = vpop.f32.mrb[34].mxu1  ;;  %v1576_v8 = vld [vmem:[#allocation2 + $0xf8] sm:$0xff] }
 0x23b   :  { %v1516_v39 = vpop.eup %1515  ;;  %1070 = vst [vmem:[#allocation8 + $0x98] sm:$0xff] %v1032_v9  ;;  %v1031_v40 = vmul.f32 %v1514_v20, %v1819_v27  ;;  %1535 = vpow2.f32 %v1177_v4  ;;  %v772_v41 = vadd.f32 %v1395_v38, %v1931_v57  ;;  %v766_v14 = vpop.f32.mrb[35].mxu1 }
 0x23c   :  { %v1518_v42 = vpop.eup %1517  ;;  %v1034_v43 = vmul.f32 %v1516_v39, %v1829_v30  ;;  %1537 = vrcp.f32 %v926_v35  ;;  %v767_v28 = vadd.f32 %v1931_v57, %v766_v14  ;;  %v1577_v35 = vld [vmem:[#allocation2 + $0xf0] sm:$0xff] }
 0x23d   :  { %v1520_v19 = vpop.eup %1519  ;;  %1069 = vst [vmem:[#allocation8 + $0x90] sm:$0xff] %v1031_v40  ;;  %v1033_v44 = vmul.f32 %v1518_v42, %v1825_v29  ;;  %1539 = vpow2.f32 %v1180_v25  ;;  %v1182_v13 = vmul.f32 -1.442695, %v772_v41  ;;  %v1578_v40 = vld [vmem:[#allocation2 + $0x108] sm:$0xff]  ;;  %v1579_v42 = vld [vmem:[#allocation2 + $0x100] sm:$0xff] }
 0x23e   :  { %v1522_v45 = vpop.eup %1521  ;;  %1072 = vst [vmem:[#allocation8 + $0xa8] sm:$0xff] %v1034_v43  ;;  %v925_v22 = vadd.f32 1.0, %v1520_v19  ;;  %1541 = vpow2.f32 %v1179_v37  ;;  %v1181_v27 = vmul.f32 -1.442695, %v767_v28  ;;  %v1398_v46 = vpop.f32.mrb[36].mxu1  ;;  %v1580_v28 = vld [vmem:[#allocation2 + $0x118] sm:$0xff] }
 0x23f   :  { %v1524_v47 = vpop.eup %1523  ;;  %1071 = vst [vmem:[#allocation8 + $0xa0] sm:$0xff] %v1033_v44  ;;  %v928_v48 = vadd.f32 1.0, %v1522_v45  ;;  %1543 = vpow2.f32 %v1182_v13  ;;  %v782_v30 = vadd.f32 %v1398_v46, %v1931_v57  ;;  %v776_v49 = vpop.f32.mrb[37].mxu1  ;;  %v1581_v45 = vld [vmem:[#allocation2 + $0x110] sm:$0xff] }
 0x240   :  { %v1526_v51 = vpop.eup %1525  ;;  %v1036_v52 = vmul.f32 %v1524_v47, %v1835_v32  ;;  %1545 = vrcp.f32 %v925_v22  ;;  %v777_v29 = vadd.f32 %v1931_v57, %v776_v49 }
 0x241   :  { %v1528_v53 = vpop.eup %1527  ;;  %v1035_v54 = vmul.f32 %v1526_v51, %v1831_v31  ;;  %1547 = vrcp.f32 %v928_v48  ;;  %v1184_v21 = vmul.f32 -1.442695, %v782_v30  ;;  %v1583_v48 = vld [vmem:[#allocation2 + $0x120] sm:$0xff] }
 0x242   :  { %v1530_v16 = vpop.eup %1529  ;;  %1074 = vst [vmem:[#allocation8 + $0xb8] sm:$0xff] %v1036_v52  ;;  %v927_v55 = vadd.f32 1.0, %v1528_v53  ;;  %1549 = vpow2.f32 %v1181_v27  ;;  %v1183_v10 = vmul.f32 -1.442695, %v777_v29  ;;  %v1582_v27 = vld [vmem:[#allocation2 + $0x128] sm:$0xff] }
 0x243   :  { %v1532_v56 = vpop.eup %1531  ;;  %1073 = vst [vmem:[#allocation8 + $0xb0] sm:$0xff] %v1035_v54  ;;  %v930_v58 = vadd.f32 1.0, %v1530_v16  ;;  %1551 = vpow2.f32 %v1184_v21 }
 0x244   :  { %v1534_v59 = vpop.eup %1533  ;;  %v1038_v32 = vmul.f32 %v1532_v56, %v1841_v34  ;;  %1553 = vrcp.f32 %v927_v55 }
 0x245   :  { %v1536_v5 = vpop.eup %1535  ;;  %v1037_v57 = vmul.f32 %v1534_v59, %v1837_v33  ;;  %1555 = vrcp.f32 %v930_v58  ;;  %v1573_v33 = vld [vmem:[#allocation2 + $0xd0] sm:$0xff] }
 0x246   :  { %v1538_v31 = vpop.eup %1537  ;;  %1076 = vst [vmem:[#allocation8 + $0xc8] sm:$0xff] %v1038_v32  ;;  %v929_v60 = vadd.f32 1.0, %v1536_v5  ;;  %1557 = vpow2.f32 %v1183_v10 }
 0x247   :  { %v1540_v50 = vpop.eup %1539  ;;  %1075 = vst [vmem:[#allocation8 + $0xc0] sm:$0xff] %v1037_v57  ;;  %v1040_v15 = vmul.f32 %v1538_v31, %v1844_v36 }
 0x248   :  { %v1542_v61 = vpop.eup %1541  ;;  %1559 = vrcp.f32 %v929_v60  ;;  %v932_v62 = vadd.f32 1.0, %v1540_v50 }
 0x249   :  { %v1544_v24 = vpop.eup %1543  ;;  %1078 = vst [vmem:[#allocation8 + $0xd8] sm:$0xff] %v1040_v15  ;;  %v931_v18 = vadd.f32 1.0, %v1542_v61 }
 0x24a   :  { %v1546_v34 = vpop.eup %1545  ;;  %1561 = vrcp.f32 %v932_v62  ;;  %v934_v63 = vadd.f32 1.0, %v1544_v24 }
 0x24b   :  { %v1548_v23 = vpop.eup %1547  ;;  %v1039_v0 = vmul.f32 %v1573_v33, %v1546_v34  ;;  %1563 = vrcp.f32 %v931_v18 }
 0x24c   :  { %v1550_v1 = vpop.eup %1549  ;;  %v1042_v12 = vmul.f32 %v1574_v2, %v1548_v23  ;;  %1565 = vrcp.f32 %v934_v63 }
 0x24d   :  { %v1552_v3 = vpop.eup %1551  ;;  %1077 = vst [vmem:[#allocation8 + $0xd0] sm:$0xff] %v1039_v0  ;;  %v933_v36 = vadd.f32 1.0, %v1550_v1 }
 0x24e   :  { %v1554_v4 = vpop.eup %1553  ;;  %1080 = vst [vmem:[#allocation8 + $0xe8] sm:$0xff] %v1042_v12  ;;  %v936_v6 = vadd.f32 1.0, %v1552_v3 }
 0x24f   :  { %v1556_v11 = vpop.eup %1555  ;;  %v1041_v17 = vmul.f32 %v1575_v7, %v1554_v4  ;;  %1567 = vrcp.f32 %v933_v36 }
 0x250   :  { %v1558_v26 = vpop.eup %1557  ;;  %v1044_v9 = vmul.f32 %v1576_v8, %v1556_v11  ;;  %1569 = vrcp.f32 %v936_v6 }
 0x251   :  { %1079 = vst [vmem:[#allocation8 + $0xe0] sm:$0xff] %v1041_v17  ;;  %v935_v25 = vadd.f32 1.0, %v1558_v26 }
 0x252   :  { %v1560_v20 = vpop.eup %1559  ;;  %1082 = vst [vmem:[#allocation8 + $0xf8] sm:$0xff] %v1044_v9 }
 0x253   :  { %v1043_v37 = vmul.f32 %v1577_v35, %v1560_v20  ;;  %1571 = vrcp.f32 %v935_v25 }
 0x254   :  { %v1562_v38 = vpop.eup %1561 }
 0x255   :  { %v1564_v39 = vpop.eup %1563  ;;  %1081 = vst [vmem:[#allocation8 + $0xf0] sm:$0xff] %v1043_v37  ;;  %v1046_v41 = vmul.f32 %v1578_v40, %v1562_v38 }
 0x256   :  { %v1566_v14 = vpop.eup %1565  ;;  %v1045_v43 = vmul.f32 %v1579_v42, %v1564_v39 }
 0x257   :  { %1084 = vst [vmem:[#allocation8 + $0x108] sm:$0xff] %v1046_v41  ;;  %v1048_v19 = vmul.f32 %v1580_v28, %v1566_v14 }
 0x258   :  { %1083 = vst [vmem:[#allocation8 + $0x100] sm:$0xff] %v1045_v43 }
 0x259   :  { %v1568_v44 = vpop.eup %1567  ;;  %1086 = vst [vmem:[#allocation8 + $0x118] sm:$0xff] %v1048_v19 }
 0x25a   :  { %v1570_v13 = vpop.eup %1569  ;;  %v1047_v22 = vmul.f32 %v1581_v45, %v1568_v44 }
 0x25b   :  { %v1050_v46 = vmul.f32 %v1582_v27, %v1570_v13 }
 0x25c   :  { %1085 = vst [vmem:[#allocation8 + $0x110] sm:$0xff] %v1047_v22 }
 0x25d   :  { %v1572_v47 = vpop.eup %1571  ;;  %1088 = vst [vmem:[#allocation8 + $0x128] sm:$0xff] %v1050_v46 }
 0x25e   :  { %v1049_v30 = vmul.f32 %v1583_v48, %v1572_v47 }
 0x260   :  { %1087 = vst [vmem:[#allocation8 + $0x120] sm:$0xff] %v1049_v30 }
 0x261   :  { %1661 = shalt.err (!%p1658_p0)
}
 0x262   :  { %s1662_s12 = scalar_lea.hbm %s2018_s5, 4864 }
 0x263   :  { %p1663_p1 = scmp.ne.s32.totalorder %s2018_s5, %s1662_s12  ;;  %p1666_p2 = scmp.lt.u32.totalorder %s1662_s12, %s2018_s5 }
 0x265   :  { %p1668_p3 = pnand %p1666_p2, %p1663_p1 }
 0x267   :  { %1671 = shalt.err (!%p1668_p3)
}
 0x268   :  { %1100 = dma.vmem_to_hbm [thread:$0]  %s1095_s8, 4864, %s2018_s5, [#allocation4], %s1680_s30, %s1680_s30, %s1681_s6  }
 0x269   :  { %1676 = dma.done.wait [#allocation4], 4864  }
 0x26a   :  { %1677 = vsyncadd [#allocation4], 4294962432 }
 0x26b   :  { %1104 = vsyncpa [#allocation3], 1 }
 0x26c   :  { %1105 = vsyncpa [#allocation6], 1 }
 0x26d   :  { %1106 = vsyncpa [#allocation4], 1 }

</bundles_post_ra>
